<compile_context>
chip_gen: v7x
topology: tpu7x:2x2x1
jax: 0.10.0
libtpu: 0.0.40
codegen_flags: <defaults>
</compile_context>

<pallas_src>
import jax
import jax.numpy as jnp
from jax.experimental import pallas as pl
from jax.experimental.pallas import tpu as pltpu


def _make_concat_table_kernel(layer1_fn, layer2_fn):
    """Kernel: apply both branch functions to the same VMEM tile of x."""

    def kernel(x_ref, y1_ref, y2_ref):
        x = x_ref[...]                       # single load of the shared input tile
        y1_ref[...] = layer1_fn(x).astype(y1_ref.dtype)
        y2_ref[...] = layer2_fn(x).astype(y2_ref.dtype)

    return kernel


def concat_table(x, layer1_fn, layer2_fn, *, target_block_bytes=2 * 1024 * 1024):
    """Fused ConcatTable forward: returns [layer1(x), layer2(x)].

    layer1_fn / layer2_fn must be elementwise, shape-preserving jnp functions
    (they are traced inside the kernel and applied to a (TN, flat) tile).
    """
    orig_shape = x.shape
    N = orig_shape[0]
    flat = 1
    for d in orig_shape[1:]:
        flat *= int(d)

    # Metadata-only reshape for a contiguous array: gives the kernel a
    # lane-dense 2-D view (flat = 1024 is a multiple of 128 lanes).
    x2 = x.reshape(N, flat)

    # Pick rows-per-block so each VMEM buffer is ~target_block_bytes.
    dtype_size = jnp.dtype(x.dtype).itemsize
    row_bytes = flat * dtype_size
    rows_per_block = max(1, target_block_bytes // row_bytes)
    if rows_per_block >= N:
        rows_per_block = N                        # one block covers all rows
    else:
        rows_per_block = max(8, (rows_per_block // 8) * 8)  # sublane-aligned
        rows_per_block = min(rows_per_block, N)

    grid = (pl.cdiv(N, rows_per_block),)
    block_spec = pl.BlockSpec((rows_per_block, flat), lambda i: (i, 0))

    y1, y2 = pl.pallas_call(
        _make_concat_table_kernel(layer1_fn, layer2_fn),
        out_shape=(
            jax.ShapeDtypeStruct((N, flat), x.dtype),
            jax.ShapeDtypeStruct((N, flat), x.dtype),
        ),
        grid_spec=pltpu.PrefetchScalarGridSpec(
            num_scalar_prefetch=0,
            grid=grid,
            in_specs=[block_spec],
            out_specs=(block_spec, block_spec),
        ),
        compiler_params=pltpu.CompilerParams(
            dimension_semantics=("parallel",),
        ),
    )(x2)

    # Metadata-only reshapes back to the original layout.
    return [y1.reshape(orig_shape), y2.reshape(orig_shape)]


class ConcatTable:
    """Pallas equivalent of the PyTorch ConcatTable module."""

    # TODO(synk): non-elementwise sub-modules (Conv2d / Linear branches) need
    # their own fused kernels with weight inputs; only elementwise,
    # shape-preserving branches are fused in-kernel here.
    def __init__(self, layer1, layer2):
        self.layer1 = layer1
        self.layer2 = layer2

    def __call__(self, x):
        return concat_table(x, self.layer1, self.layer2)


if __name__ == "__main__":
    key = jax.random.PRNGKey(0)
    # Small NCHW input consistent with a conv-net feature map.
    x = jax.random.normal(key, (2, 4, 16, 16), dtype=jnp.float32)

    # Concrete example branches (nn.ReLU() and nn.Tanh() equivalents).
    layer1 = lambda t: jnp.maximum(t, jnp.zeros((), t.dtype))
    layer2 = jnp.tanh

    module = ConcatTable(layer1, layer2)
    y = module(x)
    y = jax.block_until_ready(y)

    ref1 = jnp.maximum(x, 0.0)
    ref2 = jnp.tanh(x)

    assert isinstance(y, list) and len(y) == 2
    assert y[0].shape == x.shape and y[1].shape == x.shape
    assert y[0].dtype == x.dtype and y[1].dtype == x.dtype
    assert jnp.allclose(y[0], ref1, atol=1e-6), "branch 1 mismatch"
    assert jnp.allclose(y[1], ref2, atol=1e-6), "branch 2 mismatch"

    print("KERNEL_OK")
</pallas_src>

<mosaic_0001>
module attributes {stable_mosaic.version = 11 : i64} {
  func.func @kernel(%arg0: i32, %arg1: memref<2x1024xf32, #tpu.memory_space<vmem>>, %arg2: memref<2x1024xf32, #tpu.memory_space<vmem>>, %arg3: memref<2x1024xf32, #tpu.memory_space<vmem>>) attributes {dimension_semantics = [#tpu.dimension_semantics<parallel>], iteration_bounds = array<i64: 1>, scalar_prefetch = 0 : i64, scratch_operands = 0 : i64, tpu.core_type = #tpu.core_type<tc>, window_params = [{transform_indices = @transform_0, window_bounds = array<i64: 2, 1024>}, {transform_indices = @transform_1, window_bounds = array<i64: 2, 1024>}, {transform_indices = @transform_2, window_bounds = array<i64: 2, 1024>}]} {
    %c0 = arith.constant 0 : index
    %c0_0 = arith.constant 0 : index
    %0 = vector.load %arg1[%c0, %c0_0] : memref<2x1024xf32, #tpu.memory_space<vmem>>, vector<2x1024xf32>
    %cst = arith.constant 0.000000e+00 : f32
    %1 = vector.broadcast %cst : f32 to vector<2x1024xf32>
    %2 = arith.maximumf %0, %1 : vector<2x1024xf32>
    %c0_1 = arith.constant 0 : index
    %c0_2 = arith.constant 0 : index
    %3 = vector.load %arg2[%c0_1, %c0_2] : memref<2x1024xf32, #tpu.memory_space<vmem>>, vector<2x1024xf32>
    tpu.vector_store %arg2[%c0_1, %c0_2], %2 {strides = array<i32>} : memref<2x1024xf32, #tpu.memory_space<vmem>>, vector<2x1024xf32>,
    %4 = math.tanh %0 : vector<2x1024xf32>
    %c0_3 = arith.constant 0 : index
    %c0_4 = arith.constant 0 : index
    %5 = vector.load %arg3[%c0_3, %c0_4] : memref<2x1024xf32, #tpu.memory_space<vmem>>, vector<2x1024xf32>
    tpu.vector_store %arg3[%c0_3, %c0_4], %4 {strides = array<i32>} : memref<2x1024xf32, #tpu.memory_space<vmem>>, vector<2x1024xf32>,
    return
  }
  func.func @transform_0(%arg0: i32) -> (i32, i32) {
    %c0_i32 = arith.constant 0 : i32
    %c0_i32_0 = arith.constant 0 : i32
    return %arg0, %c0_i32 : i32, i32
  }
  func.func @transform_1(%arg0: i32) -> (i32, i32) {
    %c0_i32 = arith.constant 0 : i32
    %c0_i32_0 = arith.constant 0 : i32
    return %arg0, %c0_i32 : i32, i32
  }
  func.func @transform_2(%arg0: i32) -> (i32, i32) {
    %c0_i32 = arith.constant 0 : i32
    %c0_i32_0 = arith.constant 0 : i32
    return %arg0, %c0_i32 : i32, i32
  }
}

</mosaic_0001>

<bundles_post_ra>
// kernel: tpu_custom_call.1
= control target key start
LH: loop header
LB: loop body
LE: loop exit
PB: predicated region body
PF: predicated region fallthrough
CT: control target
= control target key end

     0   :  { %8 = vsyncpa [#allocation3], 0  ;;  %s196_s0 = inlined_call_operand.hbm [shape: f32[2,1024], index: 0, kind: input, shape index: {}]   ;;  %s197_s1 = inlined_call_operand.hbm [shape: f32[2,1024], index: 1, kind: output, shape index: {0}]   ;;  %s198_s2 = inlined_call_operand.hbm [shape: f32[2,1024], index: 2, kind: output, shape index: {1}]  }
   0x1   :  { %9 = vsyncpa [#allocation4], 0 }
   0x2   :  { %10 = vsyncpa [#allocation7], 0  ;;  %s142_s9 = smov [#allocation2]   ;;  %s70_s13 = scalar_lea.hbm %s196_s0, 256 }
   0x3   :  { %s17_s10 = sshll.u32 %s142_s9, 4  ;;  %p71_p0 = scmp.ne.s32.totalorder %s196_s0, %s70_s13  ;;  %s18_s10 = int_to_ptr.vmem [resolvable:$true] %s17_s10 }
   0x4   :  { %p74_p1 = scmp.lt.u32.totalorder %s70_s13, %s196_s0 }
   0x6   :  { %p76_p2 = pnand %p74_p1, %p71_p0 }
   0x8   :  { %79 = shalt.err (!%p76_p2)
}
   0x9   :  { %s80_s18 = scalar_lea.vmem %s18_s10, 256  ;;  %p85_p4 = scmp.lt.s32.totalorder %s18_s10, %s18_s10 }
   0xa   :  { %p81_p3 = scmp.ne.s32.totalorder %s18_s10, %s80_s18  ;;  %p86_p5 = scmp.lt.s32.totalorder %s80_s18, %s80_s18 }
   0xc   :  { %p87_p6 = por %p86_p5, %p85_p4 }
   0xe   :  { %p88_p7 = pnand %p87_p6, %p81_p3 }
  0x10   :  { %91 = shalt.err (!%p88_p7)
}
  0x11   :  { %20 = dma.hbm_to_vmem [thread:$0]  %s196_s0, 256, %s18_s10, [#allocation3]  }
  0x12   :  { %136 = dma.done.wait [#allocation3], 256  }
  0x13   :  { %137 = vsyncadd [#allocation3], 4294967040  ;;  %s143_s21 = smov [#allocation5]   ;;  %v24_v0 = vld [vmem:[#allocation2] sm:$0xff]  ;;  %v25_v1 = vld [vmem:[#allocation2 + $0x8] sm:$0xff] }
  0x14   :  { %s40_s22 = sshll.u32 %s143_s21, 4  ;;  %v26_v2 = vmax.f32 %v24_v0, 0.0  ;;  %66 = vtanh.f32 %v24_v0  ;;  %v27_v3 = vmax.f32 %v25_v1, 0.0  ;;  %s41_s22 = int_to_ptr.vmem [resolvable:$true] %s40_s22 }
  0x15   :  { %68 = vtanh.f32 %v25_v1  ;;  %s92_s23 = scalar_lea.vmem %s41_s22, 256  ;;  %p97_p9 = scmp.lt.s32.totalorder %s41_s22, %s41_s22 }
  0x16   :  { %28 = vst [vmem:[#allocation5] sm:$0xff] %v26_v2  ;;  %29 = vst [vmem:[#allocation5 + $0x8] sm:$0xff] %v27_v3  ;;  %p93_p8 = scmp.ne.s32.totalorder %s41_s22, %s92_s23  ;;  %p98_p10 = scmp.lt.s32.totalorder %s92_s23, %s92_s23 }
  0x18   :  { %p99_p11 = por %p98_p10, %p97_p9 }
  0x1a   :  { %p100_p12 = pnand %p99_p11, %p93_p8 }
  0x1c   :  { %103 = shalt.err (!%p100_p12)
}
  0x1d   :  { %s104_s25 = scalar_lea.hbm %s197_s1, 256 }
  0x1e   :  { %p105_p13 = scmp.ne.s32.totalorder %s197_s1, %s104_s25  ;;  %p108_p0 = scmp.lt.u32.totalorder %s104_s25, %s197_s1 }
  0x20   :  { %p110_p1 = pnand %p108_p0, %p105_p13 }
  0x22   :  { %113 = shalt.err (!%p110_p1)
}
  0x23   :  { %43 = dma.vmem_to_hbm [thread:$0]  %s41_s22, 256, %s197_s1, [#allocation4]   ;;  %v67_v4 = vpop.eup %66 }
  0x24   :  { %s144_s4 = smov [#allocation6]   ;;  %v69_v5 = vpop.eup %68  ;;  %32 = vst [vmem:[#allocation6] sm:$0xff] %v67_v4 }
  0x25   :  { %s50_s5 = sshll.u32 %s144_s4, 4  ;;  %33 = vst [vmem:[#allocation6 + $0x8] sm:$0xff] %v69_v5  ;;  %s51_s5 = int_to_ptr.vmem [resolvable:$true] %s50_s5 }
  0x26   :  { %s114_s6 = scalar_lea.vmem %s51_s5, 256  ;;  %p119_p3 = scmp.lt.s32.totalorder %s51_s5, %s51_s5 }
  0x27   :  { %p115_p2 = scmp.ne.s32.totalorder %s51_s5, %s114_s6  ;;  %p120_p4 = scmp.lt.s32.totalorder %s114_s6, %s114_s6 }
  0x29   :  { %p121_p5 = por %p120_p4, %p119_p3 }
  0x2b   :  { %p122_p6 = pnand %p121_p5, %p115_p2 }
  0x2d   :  { %125 = shalt.err (!%p122_p6)
}
  0x2e   :  { %s126_s9 = scalar_lea.hbm %s198_s2, 256 }
  0x2f   :  { %p127_p7 = scmp.ne.s32.totalorder %s198_s2, %s126_s9  ;;  %p130_p8 = scmp.lt.u32.totalorder %s126_s9, %s198_s2 }
  0x31   :  { %p132_p9 = pnand %p130_p8, %p127_p7 }
  0x33   :  { %135 = shalt.err (!%p132_p9)
}
  0x34   :  { %53 = dma.vmem_to_hbm [thread:$0]  %s51_s5, 256, %s198_s2, [#allocation7]  }
  0x35   :  { %138 = dma.done.wait [#allocation4], 256  }
  0x36   :  { %139 = vsyncadd [#allocation4], 4294967040 }
  0x37   :  { %140 = dma.done.wait [#allocation7], 256  }
  0x38   :  { %141 = vsyncadd [#allocation7], 4294967040 }
  0x39   :  { %60 = vsyncpa [#allocation3], 1 }
  0x3a   :  { %61 = vsyncpa [#allocation4], 1 }
  0x3b   :  { %62 = vsyncpa [#allocation7], 1 }

</bundles_post_ra>
